<compile_context>
chip_gen: v7x
topology: tpu7x:2x2x1
jax: 0.10.0
libtpu: 0.0.40
codegen_flags: <defaults>
</compile_context>

<pallas_src>
import jax
import jax.numpy as jnp
from jax.experimental import pallas as pl
from jax.experimental.pallas import tpu as pltpu


def _maxpool2x2_fused_kernel(x_ref, o_ref, t_ref):
    """Pool one fused (rows, W) slab down to (rows//2, W//2).

    x_ref : (rows, W)        rows = block_c * H  (rows even)
    o_ref : (rows//2, W//2)
    t_ref : (W, rows//2)     scratch holding the H-reduced slab transposed, so
                             the W pair-max is also a sublane-strided access.
    """
    rows, w = x_ref.shape
    rh = rows // 2
    wo = w // 2

    # ---- H pair-max: one pair of sublane-stride-2 loads over the whole slab.
    # Valid across channel boundaries because H is even (pairs never split).
    xh = jnp.maximum(x_ref[pl.ds(0, rh, stride=2), :],
                     x_ref[pl.ds(1, rh, stride=2), :])          # (rh, w)

    # ---- W pair-max: one dense transpose so column pairs become sublane
    # pairs, one strided pair + max, one transpose back.  Scratch last dim is
    # rh (multiple of 128 at the production shape) -> unmasked lane-dense vst.
    t_ref[...] = xh.T                                           # (w, rh)
    pooled_t = jnp.maximum(t_ref[pl.ds(0, wo, stride=2), :],
                           t_ref[pl.ds(1, wo, stride=2), :])    # (wo, rh)

    o_ref[...] = pooled_t.T                                     # (rh, wo)


def _choose_block_c(c, h, w, itemsize):
    """Pick a channel-tile size: ~1 MiB input blocks, >= 8 grid steps when
    possible, and fused block rows a multiple of 16 so both input and output
    blocks keep the (8, 128) second-minor alignment."""
    target_bytes = 1 << 20
    min_steps = 8
    cands = [d for d in range(1, c + 1)
             if c % d == 0 and ((d * h) % 16 == 0 or d == c)]
    if not cands:
        return c

    def nbytes(d):
        return d * h * w * itemsize

    good = [d for d in cands
            if nbytes(d) <= target_bytes and c // d >= min(min_steps, c)]
    if good:
        return max(good)
    small = [d for d in cands if nbytes(d) <= target_bytes]
    if small:
        return max(small)
    return min(cands)


def maxpool2d_2x2(x_nchw, *, block_c=None):
    """MaxPool2d(kernel_size=2, stride=2, padding=0, dilation=1,
    ceil_mode=False) on an NCHW tensor (torch floor-mode semantics)."""
    n, c, h, w = x_nchw.shape

    if h % 2:
        # TODO(synk): fused (C*H, W) layout needs even H; floor-mode crop of
        # the trailing row costs one extra HBM copy, but production H=112 is
        # even so this branch is off the hot path.  Odd W needs NO crop: the
        # strided column loads of size W//2 never touch the last column.
        x_nchw = x_nchw[:, :, : h - 1, :]
        h -= 1

    ho, wo = h // 2, w // 2
    itemsize = jnp.dtype(x_nchw.dtype).itemsize

    if block_c is None:
        block_c = _choose_block_c(c, h, w, itemsize)
    assert c % block_c == 0, (c, block_c)
    block_rows = block_c * h
    assert block_rows % 2 == 0
    # (8,128) alignment: second-minor block dims must be multiples of 8 or
    # full-extent.
    assert (block_rows % 16 == 0) or (block_c == c), (block_rows, c, block_c)

    # Free views of contiguous NCHW: (N, C, H, W) -> (N, C*H, W).
    x_fused = x_nchw.reshape(n, c * h, w)

    out_fused = pl.pallas_call(
        _maxpool2x2_fused_kernel,
        out_shape=jax.ShapeDtypeStruct((n, c * ho, wo), x_nchw.dtype),
        grid=(n, (c * h) // block_rows),
        in_specs=[
            # N squeezed; W block is full extent so no lane-divisibility issue.
            pl.BlockSpec((None, block_rows, w), lambda i, j: (i, j, 0)),
        ],
        out_specs=pl.BlockSpec((None, block_rows // 2, wo),
                               lambda i, j: (i, j, 0)),
        scratch_shapes=[pltpu.VMEM((w, block_rows // 2), x_nchw.dtype)],
        compiler_params=pltpu.CompilerParams(
            dimension_semantics=("parallel", "parallel")),
    )(x_fused)

    return out_fused.reshape(n, c, ho, wo)


def _reference_maxpool2x2(x_nchw):
    n, c, h, w = x_nchw.shape
    ho, wo = h // 2, w // 2
    x = x_nchw[:, :, : 2 * ho, : 2 * wo].reshape(n, c, ho, 2, wo, 2)
    return jnp.max(x, axis=(3, 5))


if __name__ == "__main__":
    key = jax.random.PRNGKey(0)
    # Small NCHW shape consistent with the module's forward (production shape
    # is (1, 128, 112, 112)).
    x7 = jax.random.normal(key, (2, 8, 16, 16), dtype=jnp.float32)
    ref = _reference_maxpool2x2(x7)

    # Explicit channel tile (exercises a multi-step fused-row grid).
    out = jax.block_until_ready(maxpool2d_2x2(x7, block_c=2))
    assert out.shape == (2, 8, 8, 8), out.shape
    assert jnp.allclose(out, ref), "Pallas maxpool mismatch vs reference"

    # Default block_c heuristic path.
    out2 = jax.block_until_ready(maxpool2d_2x2(x7))
    assert jnp.allclose(out2, ref), "Pallas maxpool (default tiling) mismatch"

    print("KERNEL_OK")
</pallas_src>

<mosaic_0001>
module attributes {stable_mosaic.version = 11 : i64} {
  func.func @_maxpool2x2_fused_kernel(%arg0: i32, %arg1: i32, %arg2: memref<1x32x16xf32, #tpu.memory_space<vmem>>, %arg3: memref<1x16x8xf32, #tpu.memory_space<vmem>>, %arg4: memref<16x16xf32, #tpu.memory_space<vmem>>) attributes {dimension_semantics = [#tpu.dimension_semantics<parallel>, #tpu.dimension_semantics<parallel>], iteration_bounds = array<i64: 2, 4>, scalar_prefetch = 0 : i64, scratch_operands = 1 : i64, tpu.core_type = #tpu.core_type<tc>, window_params = [{transform_indices = @transform_0, window_bounds = array<i64: 1, 32, 16>}, {transform_indices = @transform_1, window_bounds = array<i64: 1, 16, 8>}]} {
    %c0 = arith.constant 0 : index
    %c0_0 = arith.constant 0 : index
    %c0_1 = arith.constant 0 : index
    %0 = tpu.strided_load %arg2[%c0, %c0_0, %c0_1] {strides = array<i32: 1, 2, 1>} : memref<1x32x16xf32, #tpu.memory_space<vmem>>, vector<1x16x16xf32>
    %1 = vector.shape_cast %0 : vector<1x16x16xf32> to vector<16x16xf32>
    %c0_2 = arith.constant 0 : index
    %c1 = arith.constant 1 : index
    %c0_3 = arith.constant 0 : index
    %2 = tpu.strided_load %arg2[%c0_2, %c1, %c0_3] {strides = array<i32: 1, 2, 1>} : memref<1x32x16xf32, #tpu.memory_space<vmem>>, vector<1x16x16xf32>
    %3 = vector.shape_cast %2 : vector<1x16x16xf32> to vector<16x16xf32>
    %4 = arith.maximumf %1, %3 : vector<16x16xf32>
    %5 = tpu.transpose %4, [1, 0] : vector<16x16xf32> -> vector<16x16xf32>
    %c0_4 = arith.constant 0 : index
    %c0_5 = arith.constant 0 : index
    %6 = vector.load %arg4[%c0_4, %c0_5] : memref<16x16xf32, #tpu.memory_space<vmem>>, vector<16x16xf32>
    tpu.vector_store %arg4[%c0_4, %c0_5], %5 {strides = array<i32>} : memref<16x16xf32, #tpu.memory_space<vmem>>, vector<16x16xf32>,
    %c0_6 = arith.constant 0 : index
    %c0_7 = arith.constant 0 : index
    %7 = tpu.strided_load %arg4[%c0_6, %c0_7] {strides = array<i32: 2, 1>} : memref<16x16xf32, #tpu.memory_space<vmem>>, vector<8x16xf32>
    %c1_8 = arith.constant 1 : index
    %c0_9 = arith.constant 0 : index
    %8 = tpu.strided_load %arg4[%c1_8, %c0_9] {strides = array<i32: 2, 1>} : memref<16x16xf32, #tpu.memory_space<vmem>>, vector<8x16xf32>
    %9 = arith.maximumf %7, %8 : vector<8x16xf32>
    %10 = tpu.transpose %9, [1, 0] : vector<8x16xf32> -> vector<16x8xf32>
    %c0_10 = arith.constant 0 : index
    %c0_11 = arith.constant 0 : index
    %c0_12 = arith.constant 0 : index
    %11 = vector.load %arg3[%c0_10, %c0_11, %c0_12] : memref<1x16x8xf32, #tpu.memory_space<vmem>>, vector<1x16x8xf32>
    %12 = vector.shape_cast %11 : vector<1x16x8xf32> to vector<16x8xf32>
    %13 = vector.shape_cast %10 : vector<16x8xf32> to vector<1x16x8xf32>
    tpu.vector_store %arg3[%c0_10, %c0_11, %c0_12], %13 {strides = array<i32>} : memref<1x16x8xf32, #tpu.memory_space<vmem>>, vector<1x16x8xf32>,
    return
  }
  func.func @transform_0(%arg0: i32, %arg1: i32) -> (i32, i32, i32) {
    %c0_i32 = arith.constant 0 : i32
    %c0_i32_0 = arith.constant 0 : i32
    return %arg0, %arg1, %c0_i32 : i32, i32, i32
  }
  func.func @transform_1(%arg0: i32, %arg1: i32) -> (i32, i32, i32) {
    %c0_i32 = arith.constant 0 : i32
    %c0_i32_0 = arith.constant 0 : i32
    return %arg0, %arg1, %c0_i32 : i32, i32, i32
  }
}

</mosaic_0001>

<bundles_post_ra>
// kernel: tpu_custom_call.1
= control target key start
LH: loop header
LB: loop body
LE: loop exit
PB: predicated region body
PF: predicated region fallthrough
CT: control target
= control target key end

     0   :  { %s436_s6 = smov 0   ;;  %s438_s7 = smov 0   ;;  %s491_s0 = inlined_call_operand.vmem [shape: f32[2,128,16], index: 0, kind: input, shape index: {}]   ;;  %s492_s1 = inlined_call_operand.vmem [shape: f32[2,64,8], index: 1, kind: output, shape index: {}]  }
   0x1   :  { %s440_s8 = smov 0   ;;  %s442_s9 = smov 0  }
   0x2   :  { %s444_s10 = smov 0  }
   0x3 LB: > { %s20_s11 = sadd.s32 1, %s416_s8  ;;  %s23_s12 = sadd.s32 1, %s420_s9  ;;  %s424_s10 = sphi %s444_s10, %s11_s10   ;;  %s420_s9 = sphi %s442_s9, %s496_s9   ;;  %s416_s8 = sphi %s440_s8, %s495_s8   ;;  %s412_s7 = sphi %s438_s7, %s494_s7   ;;  %s408_s6 = sphi %s436_s6, %s493_s6  }
   0x4   : > { %p21_p0 = scmp.ge.s32.totalorder %s20_s11, 4  ;;  %p333_p1 = scmp.ge.s32.totalorder %s424_s10, 1 }
   0x5   : > { %p108_p2 = scmp.lt.s32.totalorder %s424_s10, 9 }
   0x6   : > { %s498_s11 = smov (%p21_p0, %s20_s11), 0  ;;  %s500_s12 = smov (!%p21_p0, %s23_s12), %s420_s9 }
   0x7   : > { %p109_p3 = pnand %p333_p1, %p108_p2  ;;  %p25_p4 = scmp.ge.s32.totalorder %s500_s12, 2 }
   0x8   : > { %s334_s13 = sshll.u32 (!%p109_p3), %s408_s6, 2  ;;  %p137_p5 = scmp.lt.s32.totalorder (!%p109_p3), %s412_s7, 1  ;;  %vm197_vm0 = vcmask (!%p109_p3), 130048   ;;  %vm236_vm1 = vcmask (!%p109_p3), 64512  }
   0x9   : > { %s502_s12 = smov (%p25_p4, %s500_s12), 0  ;;  %112 = sbr.rel (%p109_p3) target bundleno = 301 (0x12d), region = 24 }
   0xa   : > { %p139_p6 = scmp.lt.s32.totalorder (!%p109_p3), %s334_s13, 15  ;;  %s337_s20 = sshll.u32 (!%p109_p3), %s408_s6, 1 }
   0xb   : > { %p149_p7 = scmp.lt.s32.totalorder (!%p109_p3), %s337_s20, 7 }
  0x10   : > { %s504_s7 = smov (!%p137_p5, %s412_s7), 1  ;;  %s506_s13 = smov (!%p139_p6, %s334_s13), 15 }
  0x11   : > { %s335_s14 = sshll.u32 %s504_s7, 4  ;;  %s508_s20 = smov (!%p149_p7, %s337_s20), 7 }
  0x12   : > { %s142_s15 = sadd.s32 %s335_s14, %s506_s13  ;;  %s338_s21 = sshll.u32 %s504_s7, 3 }
  0x13   : > { %s336_s16 = sshll.u32 %s142_s15, 3  ;;  %s152_s22 = sadd.s32 %s338_s21, %s508_s20 }
  0x14   : > { %s144_s19 = scalar_lea.vmem %s491_s0, %s336_s16  ;;  %s339_s23 = sshll.u32 %s152_s22, 3 }
  0x15   : > { %v156_v0 = vld [vmem:[%s144_s19] ss:$2 sm:$0xff]  ;;  %v341_v1 = vld [vmem:[%s144_s19 + $0x1] ss:$2 sm:$0xff]  ;;  %v340_v2 = vld [vmem:[%s144_s19 + $0x10] ss:$2 sm:$0xff]  ;;  %s154_s26 = scalar_lea.vmem %s492_s1, %s339_s23 }
  0x16   : > { %v163_v3 = vmax.f32 %v156_v0, %v341_v1  ;;  %v342_v4 = vld [vmem:[%s144_s19 + $0x11] ss:$2 sm:$0xff] }
  0x17   : > { %v164_v5 = vmax.f32 %v340_v2, %v342_v4 }
  0x18   : > { %165 = vxpose.xlu0.b32.start [1/2] (short) (narrow) %v163_v3, 16 }
  0x1c   : > { %166 = vxpose.xlu0.b32.end [2/2] (short) (narrow) %v164_v5, 16 }
  0x98   : > { %v181_v6 = vpop.trf.xlu0 }
  0x99   : > { %198 = vst.msk [vmem:[#allocation2] sm:$0xff] %vm197_vm0, %v181_v6 }
  0x9c   : > { %v182_v7 = vpop.trf.xlu0 }
  0x9d   : > { %199 = vst.msk [vmem:[#allocation2 + $0x8] sm:$0xff] %vm197_vm0, %v182_v7 }
  0xa4   : > { %v200_v8 = vld [vmem:[#allocation2] ss:$2 sm:$0xff]  ;;  %v202_v9 = vld [vmem:[#allocation2 + $0x1] ss:$2 sm:$0xff] }
  0xa5   : > { %v203_v10 = vmax.f32 %v200_v8, %v202_v9 }
  0xa7   : > { %204 = vxpose.xlu1.b32.start.end [1/1] (short) (narrow) %v203_v10, 16 }
 0x127   : > { %v220_v11 = vpop.trf.xlu1 }
 0x128   : > { %237 = vst.msk [vmem:[%s154_s26] sm:$0xff] %vm236_vm1, %v220_v11 }
 0x12b   : > { %v221_v12 = vpop.trf.xlu1 }
 0x12c   : > { %238 = vst.msk [vmem:[%s154_s26 + $0x8] sm:$0xff] %vm236_vm1, %v221_v12 }
 0x12d PF: > { %s11_s10 = sadd.s32 1, %s424_s10   ;;  %s493_s6 = smov %s416_s8 }
 0x12e   : > { %p8_p8 = scmp.ge.s32.totalorder %s11_s10, 10   ;;  %s494_s7 = smov %s420_s9 }
 0x12f   : > { %s495_s8 = smov %s498_s11  ;;  %s496_s9 = smov %s502_s12 }
 0x130   :  { %10 = sbr.rel (!%p8_p8) target bundleno = 3 (0x3), region = 58 }

</bundles_post_ra>
